<compile_context>
chip_gen: v7x
topology: tpu7x:2x2x1
jax: 0.10.0
libtpu: 0.0.40
codegen_flags: <defaults>
</compile_context>

<pallas_src>
import jax
import jax.numpy as jnp
from jax.experimental import pallas as pl
from jax.experimental.pallas import tpu as pltpu

_D = 28 * 28      # 784, fixed by the module
_D_PAD = 896      # 7 * 128  -> lane-dense rows / output slab
_H_PAD = 128      # hidden padded to one full lane group


def _round_up(x: int, m: int) -> int:
    return ((x + m - 1) // m) * m


def _a4_kernel(x_ref, w1t_ref, b1_ref, w2t_ref, b2_ref, o_ref):
    # x:   [TM, dp]  bf16
    # w1t: [dp, hp]  bf16    b1: [1, hp] f32
    # w2t: [hp, dp]  bf16    b2: [1, dp] f32
    hid = jnp.dot(x_ref[...], w1t_ref[...],
                  preferred_element_type=jnp.float32) + b1_ref[...]
    out = jnp.dot(hid.astype(jnp.bfloat16), w2t_ref[...],
                  preferred_element_type=jnp.float32) + b2_ref[...]
    o_ref[...] = out.astype(o_ref.dtype)


def a4_forward(x, w1, b1, w2, b2):
    """Forward pass of A4Model (non_linear=False).

    x:  [N, 784] float32
    w1: [h, 784], b1: [h]    (PyTorch Linear(784, h) layout)
    w2: [784, h], b2: [784]  (PyTorch Linear(h, 784) layout)
    returns [N, 784] float32
    """
    n, d = x.shape
    assert d == _D, f"A4Model fixes d = 784, got {d}"
    h = w1.shape[0]
    assert h <= _H_PAD, "hidden width > 128 not handled by this padded kernel"

    dp, hp = _D_PAD, _H_PAD
    tile_m = min(256, _round_up(n, 8))          # 128/256-class tiles; >=8 sublanes
    n_pad = _round_up(n, tile_m)

    # Glue / layout plumbing (all zero-padding => exact for this affine model):
    #  - weights pre-transposed to [d, h] / [h, d] so the kernel is two plain
    #    MXU matmuls, no in-kernel transposes
    #  - bf16 weights & activations, f32 biases and accumulation
    x_p = jnp.zeros((n_pad, dp), jnp.bfloat16).at[:n, :d].set(
        x.astype(jnp.bfloat16))
    w1t = jnp.zeros((dp, hp), jnp.bfloat16).at[:d, :h].set(
        jnp.asarray(w1, jnp.float32).T.astype(jnp.bfloat16))
    w2t = jnp.zeros((hp, dp), jnp.bfloat16).at[:h, :d].set(
        jnp.asarray(w2, jnp.float32).T.astype(jnp.bfloat16))
    b1p = jnp.zeros((1, hp), jnp.float32).at[0, :h].set(
        jnp.asarray(b1, jnp.float32))
    b2p = jnp.zeros((1, dp), jnp.float32).at[0, :d].set(
        jnp.asarray(b2, jnp.float32))

    grid = (n_pad // tile_m,)

    out_p = pl.pallas_call(
        _a4_kernel,
        out_shape=jax.ShapeDtypeStruct((n_pad, dp), jnp.float32),
        grid=grid,
        in_specs=[
            pl.BlockSpec((tile_m, dp), lambda i: (i, 0)),   # X streams per step
            pl.BlockSpec((dp, hp), lambda i: (0, 0)),       # weights resident
            pl.BlockSpec((1, hp), lambda i: (0, 0)),
            pl.BlockSpec((hp, dp), lambda i: (0, 0)),
            pl.BlockSpec((1, dp), lambda i: (0, 0)),
        ],
        out_specs=pl.BlockSpec((tile_m, dp), lambda i: (i, 0)),
        compiler_params=pltpu.CompilerParams(
            dimension_semantics=("parallel",),              # v7x: shard over 2 TCs
        ),
    )(x_p, w1t, b1p, w2t, b2p)

    return out_p[:n, :d]


def init_a4_params(key, d, h):
    """Deterministic init mirroring torch.nn.Linear default (U[-1/sqrt(fan_in), 1/sqrt(fan_in)])."""
    k1, k2, k3, k4 = jax.random.split(key, 4)
    s1 = 1.0 / jnp.sqrt(jnp.float32(d))
    s2 = 1.0 / jnp.sqrt(jnp.float32(h))
    w1 = jax.random.uniform(k1, (h, d), jnp.float32, -s1, s1)
    b1 = jax.random.uniform(k2, (h,), jnp.float32, -s1, s1)
    w2 = jax.random.uniform(k3, (d, h), jnp.float32, -s2, s2)
    b2 = jax.random.uniform(k4, (d,), jnp.float32, -s2, s2)
    return w1, b1, w2, b2


if __name__ == "__main__":
    d = 28 * 28      # fixed by the module
    h = 32           # hidden width
    n = 8            # small batch

    key = jax.random.PRNGKey(0)
    kx, kp = jax.random.split(key)
    x = jax.random.normal(kx, (n, d), jnp.float32)
    w1, b1, w2, b2 = init_a4_params(kp, d, h)

    fwd = jax.jit(a4_forward)
    out = jax.block_until_ready(fwd(x, w1, b1, w2, b2))

    # Reference check in plain JAX (same math as PyTorch forward, non_linear=False).
    # Tolerance loosened vs. the f32 version because weights/activations are bf16.
    ref = (x @ w1.T + b1) @ w2.T + b2
    assert out.shape == (n, d)
    assert jnp.allclose(out, ref, atol=2e-2, rtol=2e-2), (
        float(jnp.max(jnp.abs(out - ref))))

    print("KERNEL_OK")
</pallas_src>

<mosaic_0001>
module attributes {stable_mosaic.version = 11 : i64} {
  func.func @_a4_kernel(%arg0: i32, %arg1: memref<8x896xbf16, #tpu.memory_space<vmem>>, %arg2: memref<896x128xbf16, #tpu.memory_space<vmem>>, %arg3: memref<1x128xf32, #tpu.memory_space<vmem>>, %arg4: memref<128x896xbf16, #tpu.memory_space<vmem>>, %arg5: memref<1x896xf32, #tpu.memory_space<vmem>>, %arg6: memref<8x896xf32, #tpu.memory_space<vmem>>) attributes {dimension_semantics = [#tpu.dimension_semantics<parallel>], iteration_bounds = array<i64: 1>, scalar_prefetch = 0 : i64, scratch_operands = 0 : i64, tpu.core_type = #tpu.core_type<tc>, window_params = [{transform_indices = @transform_0, window_bounds = array<i64: 8, 896>}, {pipeline_mode = #tpu.pipeline_mode<synchronous>, transform_indices = @transform_1, window_bounds = array<i64: 896, 128>}, {pipeline_mode = #tpu.pipeline_mode<synchronous>, transform_indices = @transform_2, window_bounds = array<i64: 1, 128>}, {pipeline_mode = #tpu.pipeline_mode<synchronous>, transform_indices = @transform_3, window_bounds = array<i64: 128, 896>}, {pipeline_mode = #tpu.pipeline_mode<synchronous>, transform_indices = @transform_4, window_bounds = array<i64: 1, 896>}, {transform_indices = @transform_5, window_bounds = array<i64: 8, 896>}]} {
    %c0 = arith.constant 0 : index
    %c0_0 = arith.constant 0 : index
    %0 = vector.load %arg1[%c0, %c0_0] : memref<8x896xbf16, #tpu.memory_space<vmem>>, vector<8x896xbf16>
    %c0_1 = arith.constant 0 : index
    %c0_2 = arith.constant 0 : index
    %1 = vector.load %arg2[%c0_1, %c0_2] : memref<896x128xbf16, #tpu.memory_space<vmem>>, vector<896x128xbf16>
    %cst = arith.constant dense<0.000000e+00> : vector<8x128xf32>
    %2 = tpu.matmul %0, %1, %cst {dimension_numbers = #tpu.dot_dimension_numbers<[1], [0], [0], [1], [0, 0, 1, 1], [], []>} : vector<8x896xbf16>, vector<896x128xbf16>, vector<8x128xf32> -> vector<8x128xf32>
    %c0_3 = arith.constant 0 : index
    %c0_4 = arith.constant 0 : index
    %3 = vector.load %arg3[%c0_3, %c0_4] : memref<1x128xf32, #tpu.memory_space<vmem>>, vector<1x128xf32>
    %4 = vector.broadcast %3 : vector<1x128xf32> to vector<8x128xf32>
    %5 = arith.addf %2, %4 : vector<8x128xf32>
    %6 = arith.truncf %5 : vector<8x128xf32> to vector<8x128xbf16>
    %c0_5 = arith.constant 0 : index
    %c0_6 = arith.constant 0 : index
    %7 = vector.load %arg4[%c0_5, %c0_6] : memref<128x896xbf16, #tpu.memory_space<vmem>>, vector<128x896xbf16>
    %cst_7 = arith.constant dense<0.000000e+00> : vector<8x896xf32>
    %8 = tpu.matmul %6, %7, %cst_7 {dimension_numbers = #tpu.dot_dimension_numbers<[1], [0], [0], [1], [0, 0, 1, 1], [], []>} : vector<8x128xbf16>, vector<128x896xbf16>, vector<8x896xf32> -> vector<8x896xf32>
    %c0_8 = arith.constant 0 : index
    %c0_9 = arith.constant 0 : index
    %9 = vector.load %arg5[%c0_8, %c0_9] : memref<1x896xf32, #tpu.memory_space<vmem>>, vector<1x896xf32>
    %10 = vector.broadcast %9 : vector<1x896xf32> to vector<8x896xf32>
    %11 = arith.addf %8, %10 : vector<8x896xf32>
    %c0_10 = arith.constant 0 : index
    %c0_11 = arith.constant 0 : index
    %12 = vector.load %arg6[%c0_10, %c0_11] : memref<8x896xf32, #tpu.memory_space<vmem>>, vector<8x896xf32>
    tpu.vector_store %arg6[%c0_10, %c0_11], %11 {strides = array<i32>} : memref<8x896xf32, #tpu.memory_space<vmem>>, vector<8x896xf32>,
    return
  }
  func.func @transform_0(%arg0: i32) -> (i32, i32) {
    %c0_i32 = arith.constant 0 : i32
    %c0_i32_0 = arith.constant 0 : i32
    return %arg0, %c0_i32 : i32, i32
  }
  func.func @transform_1(%arg0: i32) -> (i32, i32) {
    %c0_i32 = arith.constant 0 : i32
    %c0_i32_0 = arith.constant 0 : i32
    %c0_i32_1 = arith.constant 0 : i32
    return %c0_i32, %c0_i32_0 : i32, i32
  }
  func.func @transform_2(%arg0: i32) -> (i32, i32) {
    %c0_i32 = arith.constant 0 : i32
    %c0_i32_0 = arith.constant 0 : i32
    %c0_i32_1 = arith.constant 0 : i32
    return %c0_i32, %c0_i32_0 : i32, i32
  }
  func.func @transform_3(%arg0: i32) -> (i32, i32) {
    %c0_i32 = arith.constant 0 : i32
    %c0_i32_0 = arith.constant 0 : i32
    %c0_i32_1 = arith.constant 0 : i32
    return %c0_i32, %c0_i32_0 : i32, i32
  }
  func.func @transform_4(%arg0: i32) -> (i32, i32) {
    %c0_i32 = arith.constant 0 : i32
    %c0_i32_0 = arith.constant 0 : i32
    %c0_i32_1 = arith.constant 0 : i32
    return %c0_i32, %c0_i32_0 : i32, i32
  }
  func.func @transform_5(%arg0: i32) -> (i32, i32) {
    %c0_i32 = arith.constant 0 : i32
    %c0_i32_0 = arith.constant 0 : i32
    return %arg0, %c0_i32 : i32, i32
  }
}

</mosaic_0001>

<bundles_post_ra>
// kernel: a4_forward.1
= control target key start
LH: loop header
LB: loop body
LE: loop exit
PB: predicated region body
PF: predicated region fallthrough
CT: control target
= control target key end

     0   :  { %v1655_v42 = vmov 0.0   ;;  %vm1656_vm0 = vmmov 0   ;;  %s2075_s0 = inlined_call_operand.vmem [shape: bf16[8,896], index: 0, kind: input, shape index: {}]   ;;  %s2076_s1 = inlined_call_operand.vmem [shape: bf16[896,128], index: 1, kind: input, shape index: {}]   ;;  %s2077_s2 = inlined_call_operand.vmem [shape: f32[1,128], index: 2, kind: input, shape index: {}]   ;;  %s2078_s3 = inlined_call_operand.vmem [shape: bf16[128,896], index: 3, kind: input, shape index: {}]   ;;  %s2079_s4 = inlined_call_operand.vmem [shape: f32[1,896], index: 4, kind: input, shape index: {}]   ;;  %s2080_s5 = inlined_call_operand.hbm [shape: f32[8,896], index: 5, kind: output, shape index: {}]  }
   0x1   :  { %v1488_v0 = vld [vmem:[%s2076_s1 + $0x40] sm:$0xff]   ;;  %v1492_v4 = vld [vmem:[%s2076_s1 + $0x48] sm:$0xff]   ;;  %v1496_v8 = vld [vmem:[%s2076_s1 + $0x50] sm:$0xff]  }
   0x2   :  { %v1489_v1 = vld [vmem:[%s2076_s1] sm:$0xff]   ;;  %1360 = vmatprep.subr.bf16.mxu0 %v1488_v0  ;;  %v1493_v5 = vld [vmem:[%s2076_s1 + $0x8] sm:$0xff]   ;;  %v1497_v9 = vld [vmem:[%s2076_s1 + $0x10] sm:$0xff]  }
   0x3   :  { %v1490_v2 = vld [vmem:[%s2076_s1 + $0xc0] sm:$0xff]   ;;  %1361 = vmatpush3.bf16.msra.mxu0 %v1489_v1  ;;  %v1494_v6 = vld [vmem:[%s2076_s1 + $0xc8] sm:$0xff]   ;;  %v1498_v10 = vld [vmem:[%s2076_s1 + $0xd0] sm:$0xff]  }
   0x4   :  { %v1491_v3 = vld [vmem:[%s2076_s1 + $0x80] sm:$0xff]   ;;  %1382 = vmatprep.subr.bf16.mxu1 %v1490_v2  ;;  %1362 = vmatprep.subr.bf16.mxu0 %v1492_v4  ;;  %v1495_v7 = vld [vmem:[%s2076_s1 + $0x88] sm:$0xff]   ;;  %v1499_v11 = vld [vmem:[%s2076_s1 + $0x90] sm:$0xff]  }
   0x5   :  { %1383 = vmatpush3.bf16.msra.mxu1 %v1491_v3  ;;  %v1500_v12 = vld [vmem:[%s2076_s1 + $0x58] sm:$0xff]   ;;  %v1504_v16 = vld [vmem:[%s2076_s1 + $0x60] sm:$0xff]   ;;  %v1508_v20 = vld [vmem:[%s2076_s1 + $0x68] sm:$0xff]  }
   0x6   :  { %1384 = vmatprep.subr.bf16.mxu1 %v1494_v6  ;;  %v1501_v13 = vld [vmem:[%s2076_s1 + $0x18] sm:$0xff]   ;;  %v1505_v17 = vld [vmem:[%s2076_s1 + $0x20] sm:$0xff]   ;;  %v1509_v21 = vld [vmem:[%s2076_s1 + $0x28] sm:$0xff]  }
   0x7   :  { %1363 = vmatpush3.bf16.msra.mxu0 %v1493_v5  ;;  %v1502_v14 = vld [vmem:[%s2076_s1 + $0xd8] sm:$0xff]   ;;  %v1506_v18 = vld [vmem:[%s2076_s1 + $0xe0] sm:$0xff]   ;;  %v1510_v22 = vld [vmem:[%s2076_s1 + $0xe8] sm:$0xff]  }
   0x8   :  { %1364 = vmatprep.subr.bf16.mxu0 %v1496_v8  ;;  %v1503_v15 = vld [vmem:[%s2076_s1 + $0x98] sm:$0xff]   ;;  %v1507_v19 = vld [vmem:[%s2076_s1 + $0xa0] sm:$0xff]   ;;  %v1511_v23 = vld [vmem:[%s2076_s1 + $0xa8] sm:$0xff]  }
   0x9   :  { %1385 = vmatpush3.bf16.msra.mxu1 %v1495_v7  ;;  %v1512_v24 = vld [vmem:[%s2076_s1 + $0x70] sm:$0xff]   ;;  %v1516_v28 = vld [vmem:[%s2076_s1 + $0x78] sm:$0xff]   ;;  %v22_v31 = vld [vmem:[%s2075_s0] sm:$0xff] }
   0xa   :  { %1386 = vmatprep.subr.bf16.mxu1 %v1498_v10  ;;  %v1513_v25 = vld [vmem:[%s2076_s1 + $0x30] sm:$0xff]   ;;  %v1517_v29 = vld [vmem:[%s2076_s1 + $0x38] sm:$0xff]   ;;  %v1241_v32 = vcombine.low %v22_v31, %v22_v31  ;;  %v1242_v33 = vcombine.high %v22_v31, %v22_v31  ;;  %v1522_v35 = vld [vmem:[%s2076_s1 + $0x140] sm:$0xff]  }
   0xb   :  { %1365 = vmatpush3.bf16.msra.mxu0 %v1497_v9  ;;  %v1514_v26 = vld [vmem:[%s2076_s1 + $0xf0] sm:$0xff]   ;;  %v1518_v30 = vld [vmem:[%s2076_s1 + $0xf8] sm:$0xff]   ;;  %v23_v36 = vld [vmem:[%s2075_s0 + $0x8] sm:$0xff] }
   0xc   :  { %1366 = vmatprep.subr.bf16.mxu0 %v1500_v12  ;;  %v1515_v27 = vld [vmem:[%s2076_s1 + $0xb0] sm:$0xff]   ;;  %v1521_v34 = vld [vmem:[%s2076_s1 + $0xb8] sm:$0xff]   ;;  %538 = vmatprep.mubr.bf16.mxu0 %v1242_v33  ;;  %v1243_v37 = vcombine.low %v23_v36, %v23_v36  ;;  %v1244_v38 = vcombine.high %v23_v36, %v23_v36  ;;  %v1525_v39 = vld [vmem:[%s2076_s1 + $0x100] sm:$0xff]  }
   0xd   :  { %1387 = vmatpush3.bf16.msra.mxu1 %v1499_v11  ;;  %v1526_v40 = vld [vmem:[%s2076_s1 + $0x180] sm:$0xff]   ;;  %v1527_v41 = vld [vmem:[%s2076_s1 + $0x148] sm:$0xff]   ;;  %v1530_v45 = vld [vmem:[%s2076_s1 + $0x150] sm:$0xff]  }
   0xe   :  { %1388 = vmatprep.subr.bf16.mxu1 %v1502_v14  ;;  %578 = vmatprep.mubr.bf16.mxu1 %v1244_v38  ;;  %v1528_v43 = vld [vmem:[%s2076_s1 + $0x108] sm:$0xff]   ;;  %v1531_v46 = vld [vmem:[%s2076_s1 + $0x110] sm:$0xff]   ;;  %v1533_v48 = vld [vmem:[%s2076_s1 + $0x158] sm:$0xff]  }
   0xf   :  { %1367 = vmatpush3.bf16.msra.mxu0 %v1501_v13  ;;  %v1529_v44 = vld [vmem:[%s2076_s1 + $0x188] sm:$0xff]   ;;  %v1532_v47 = vld [vmem:[%s2076_s1 + $0x190] sm:$0xff]   ;;  %v1534_v49 = vld [vmem:[%s2076_s1 + $0x118] sm:$0xff]  }
  0x10   :  { %1368 = vmatprep.subr.bf16.mxu0 %v1504_v16  ;;  %v1536_v50 = vld [vmem:[%s2076_s1 + $0x160] sm:$0xff]   ;;  %v1535_v51 = vld [vmem:[%s2076_s1 + $0x198] sm:$0xff]   ;;  %v1539_v53 = vld [vmem:[%s2076_s1 + $0x168] sm:$0xff]  }
  0x11   :  { %1389 = vmatpush3.bf16.msra.mxu1 %v1503_v15  ;;  %v1537_v52 = vld [vmem:[%s2076_s1 + $0x120] sm:$0xff]   ;;  %v1540_v55 = vld [vmem:[%s2076_s1 + $0x128] sm:$0xff]   ;;  %v1542_v56 = vld [vmem:[%s2076_s1 + $0x170] sm:$0xff]  }
  0x12   :  { %1390 = vmatprep.subr.bf16.mxu1 %v1506_v18  ;;  %v1538_v54 = vld [vmem:[%s2076_s1 + $0x1a0] sm:$0xff]   ;;  %v1541_v57 = vld [vmem:[%s2076_s1 + $0x1a8] sm:$0xff]   ;;  %v1543_v58 = vld [vmem:[%s2076_s1 + $0x130] sm:$0xff]  }
  0x13   :  { %1369 = vmatpush3.bf16.msra.mxu0 %v1505_v17  ;;  %v24_v59 = vld [vmem:[%s2075_s0 + $0x10] sm:$0xff]  ;;  %v1545_v62 = vld [vmem:[%s2076_s1 + $0x178] sm:$0xff]  }
  0x14   :  { %1370 = vmatprep.subr.bf16.mxu0 %v1508_v20  ;;  %v1544_v60 = vld [vmem:[%s2076_s1 + $0x1b0] sm:$0xff]   ;;  %v1246_v61 = vcombine.high %v24_v59, %v24_v59  ;;  %v1546_v63 = vld [vmem:[%s2076_s1 + $0x138] sm:$0xff]   ;;  %v1245_v1 = vcombine.low %v24_v59, %v24_v59 }
  0x15   :  { %1391 = vmatpush3.bf16.msra.mxu1 %v1507_v19  ;;  %v1549_v0 = vld [vmem:[%s2076_s1 + $0x1b8] sm:$0xff]  }
  0x16   :  { %1392 = vmatprep.subr.bf16.mxu1 %v1510_v22  ;;  %v1550_v2 = vld [vmem:[%s2075_s0 + $0x18] ss:$0 sps:$4 sm:$0xff]  }
  0x17   :  { %1371 = vmatpush3.bf16.msra.mxu0 %v1509_v21 }
  0x18   :  { %1372 = vmatprep.subr.bf16.mxu0 %v1512_v24 }
  0x19   :  { %1393 = vmatpush3.bf16.msra.mxu1 %v1511_v23 }
  0x1a   :  { %1394 = vmatprep.subr.bf16.mxu1 %v1514_v26 }
  0x1b   :  { %1373 = vmatpush3.bf16.msra.mxu0 %v1513_v25 }
  0x1c   :  { %1374 = vmatprep.subr.bf16.mxu0 %v1516_v28 }
  0x1d   :  { %1395 = vmatpush3.bf16.msra.mxu1 %v1515_v27 }
  0x1e   :  { %1396 = vmatprep.subr.bf16.mxu1 %v1518_v30 }
  0x1f   :  { %1375 = vmatpush3.bf16.msra.mxu0 %v1517_v29 }
  0x20   :  { %1404 = vmatprep.subr.bf16.mxu0 %v1522_v35 }
  0x21   :  { %1397 = vmatpush3.bf16.msra.mxu1 %v1521_v34 }
  0x22   :  { %539 = vmatmul.mubr.bf16.vlgmr.msra.gmra.mrb[0].mxu0 %v1241_v32  ;;  %1444 = vmatprep.subr.bf16.mxu1 %v1655_v42 }
  0x23   :  { %1405 = vmatpush3.bf16.msra.mxu0 %v1525_v39  ;;  %618 = vmatprep.mubr.bf16.mxu0 %v1246_v61 }
  0x24   :  { %579 = vmatmul.mubr.bf16.vlgmr.msra.gmra.mrb[0].mxu1 %v1243_v37  ;;  %1406 = vmatprep.subr.bf16.mxu0 %v1527_v41 }
  0x25   :  { %1445 = vmatpush3.bf16.msra.mxu1 %v1526_v40  ;;  %1460 = vmatprep.mubr.msk.bf16.mxu1 %vm1656_vm0, %v1655_v42 }
  0x26   :  { %1446 = vmatprep.subr.bf16.mxu1 %v1655_v42 }
  0x27   :  { %1407 = vmatpush3.bf16.msra.mxu0 %v1528_v43 }
  0x28   :  { %1408 = vmatprep.subr.bf16.mxu0 %v1530_v45 }
  0x29   :  { %1447 = vmatpush3.bf16.msra.mxu1 %v1529_v44 }
  0x2a   :  { %1448 = vmatprep.subr.bf16.mxu1 %v1655_v42 }
  0x2b   :  { %1409 = vmatpush3.bf16.msra.mxu0 %v1531_v46 }
  0x2c   :  { %1410 = vmatprep.subr.bf16.mxu0 %v1533_v48 }
  0x2d   :  { %1449 = vmatpush3.bf16.msra.mxu1 %v1532_v47 }
  0x2e   :  { %1450 = vmatprep.subr.bf16.mxu1 %v1655_v42 }
  0x2f   :  { %1411 = vmatpush3.bf16.msra.mxu0 %v1534_v49 }
  0x30   :  { %1412 = vmatprep.subr.bf16.mxu0 %v1536_v50 }
  0x31   :  { %1451 = vmatpush3.bf16.msra.mxu1 %v1535_v51 }
  0x32   :  { %1452 = vmatprep.subr.bf16.mxu1 %v1655_v42 }
  0x33   :  { %1413 = vmatpush3.bf16.msra.mxu0 %v1537_v52 }
  0x34   :  { %1414 = vmatprep.subr.bf16.mxu0 %v1539_v53 }
  0x35   :  { %1453 = vmatpush3.bf16.msra.mxu1 %v1538_v54 }
  0x36   :  { %1454 = vmatprep.subr.bf16.mxu1 %v1655_v42 }
  0x37   :  { %1415 = vmatpush3.bf16.msra.mxu0 %v1540_v55 }
  0x38   :  { %1416 = vmatprep.subr.bf16.mxu0 %v1542_v56 }
  0x39   :  { %1455 = vmatpush3.bf16.msra.mxu1 %v1541_v57 }
  0x3a   :  { %1456 = vmatprep.subr.bf16.mxu1 %v1655_v42 }
  0x3b   :  { %1417 = vmatpush3.bf16.msra.mxu0 %v1543_v58 }
  0x3c   :  { %1418 = vmatprep.subr.bf16.mxu0 %v1545_v62 }
  0x3d   :  { %1457 = vmatpush3.bf16.msra.mxu1 %v1544_v60 }
  0x3e   :  { %1458 = vmatprep.subr.bf16.mxu1 %v1655_v42 }
  0x3f   :  { %1419 = vmatpush3.bf16.msra.mxu0 %v1546_v63 }
  0x41   :  { %1459 = vmatpush3.bf16.msra.mxu1 %v1549_v0 }
  0x42   :  { %619 = vmatmul.mubr.bf16.vlgmr.msra.gmra.mrb[4].mxu0 %v1245_v1 }
  0x44   :  { %1461 = vmatmul.mubr.bf16.vlgmr.msra.gmra.mrb[4].mxu1 %v1550_v2 }
  0x45   :  { %10 = vsyncpa [#allocation3], 0  ;;  %v1551_v3 = vld [vmem:[%s2078_s3] ss:$28 sps:$4 sm:$0xff]   ;;  %v1554_v5 = vld [vmem:[%s2078_s3 + $0x8] ss:$28 sps:$4 sm:$0xff]  }
  0x46   :  { %v1553_v4 = vld [vmem:[%s2078_s3 + $0x4] ss:$28 sps:$4 sm:$0xff]   ;;  %v1556_v6 = vld [vmem:[%s2078_s3 + $0xc] ss:$28 sps:$4 sm:$0xff]   ;;  %v1559_v7 = vld [vmem:[%s2078_s3 + $0x3c] ss:$28 sps:$4 sm:$0xff]  }
  0x47   :  { %1056 = vmatprep.subr.bf16.mxu0 %v1553_v4  ;;  %v1562_v8 = vld [vmem:[%s2078_s3 + $0x44] ss:$28 sps:$4 sm:$0xff]   ;;  %1097 = vmatprep.subr.bf16.mxu1 %v1556_v6  ;;  %v1557_v9 = vld [vmem:[%s2078_s3 + $0x38] ss:$28 sps:$4 sm:$0xff]   ;;  %v1563_v13 = vld [vmem:[%s2078_s3 + $0x70] ss:$28 sps:$4 sm:$0xff]  }
  0x48   :  { %1057 = vmatpush1.bf16.msra.mxu0 %v1551_v3  ;;  %1098 = vmatpush1.bf16.msra.mxu1 %v1554_v5  ;;  %v1560_v10 = vld [vmem:[%s2078_s3 + $0x40] ss:$28 sps:$4 sm:$0xff]   ;;  %v1565_v11 = vld [vmem:[%s2078_s3 + $0x74] ss:$28 sps:$4 sm:$0xff]   ;;  %v1571_v15 = vld [vmem:[%s2078_s3 + $0xac] ss:$28 sps:$4 sm:$0xff]  }
  0x49   :  { %1058 = vmatprep.subr.bf16.mxu0 %v1559_v7  ;;  %1099 = vmatprep.subr.bf16.mxu1 %v1562_v8  ;;  %v1568_v12 = vld [vmem:[%s2078_s3 + $0x7c] ss:$28 sps:$4 sm:$0xff]   ;;  %v1574_v16 = vld [vmem:[%s2078_s3 + $0xb4] ss:$28 sps:$4 sm:$0xff]   ;;  %v1569_v17 = vld [vmem:[%s2078_s3 + $0xa8] ss:$28 sps:$4 sm:$0xff]  }
  0x4a   :  { %v1566_v14 = vld [vmem:[%s2078_s3 + $0x78] ss:$28 sps:$4 sm:$0xff]   ;;  %v1572_v18 = vld [vmem:[%s2078_s3 + $0xb0] ss:$28 sps:$4 sm:$0xff]   ;;  %v1577_v19 = vld [vmem:[%s2078_s3 + $0xe4] ss:$28 sps:$4 sm:$0xff]  }
  0x4b   :  { %v1580_v20 = vld [vmem:[%s2078_s3 + $0xec] ss:$28 sps:$4 sm:$0xff]   ;;  %v1575_v21 = vld [vmem:[%s2078_s3 + $0xe0] ss:$28 sps:$4 sm:$0xff]   ;;  %v1581_v25 = vld [vmem:[%s2078_s3 + $0x118] ss:$28 sps:$4 sm:$0xff]  }
  0x4c   :  { %1059 = vmatpush1.bf16.msra.mxu0 %v1557_v9  ;;  %1100 = vmatpush1.bf16.msra.mxu1 %v1560_v10  ;;  %v1578_v22 = vld [vmem:[%s2078_s3 + $0xe8] ss:$28 sps:$4 sm:$0xff]   ;;  %v1583_v23 = vld [vmem:[%s2078_s3 + $0x11c] ss:$28 sps:$4 sm:$0xff]   ;;  %v1589_v27 = vld [vmem:[%s2078_s3 + $0x154] ss:$28 sps:$4 sm:$0xff]  }
  0x4d   :  { %1060 = vmatprep.subr.bf16.mxu0 %v1565_v11  ;;  %1101 = vmatprep.subr.bf16.mxu1 %v1568_v12  ;;  %v1586_v24 = vld [vmem:[%s2078_s3 + $0x124] ss:$28 sps:$4 sm:$0xff]   ;;  %v1592_v28 = vld [vmem:[%s2078_s3 + $0x15c] ss:$28 sps:$4 sm:$0xff]   ;;  %v1587_v29 = vld [vmem:[%s2078_s3 + $0x150] ss:$28 sps:$4 sm:$0xff]  }
  0x4e   :  { %v1584_v26 = vld [vmem:[%s2078_s3 + $0x120] ss:$28 sps:$4 sm:$0xff]   ;;  %v1590_v30 = vld [vmem:[%s2078_s3 + $0x158] ss:$28 sps:$4 sm:$0xff]   ;;  %v1595_v31 = vld [vmem:[%s2078_s3 + $0x18c] ss:$28 sps:$4 sm:$0xff]  }
  0x4f   :  { %v1598_v32 = vld [vmem:[%s2078_s3 + $0x194] ss:$28 sps:$4 sm:$0xff]   ;;  %v1593_v33 = vld [vmem:[%s2078_s3 + $0x188] ss:$28 sps:$4 sm:$0xff]   ;;  %v1657_v36 = vmov 0  }
  0x50   :  { %1061 = vmatpush1.bf16.msra.mxu0 %v1563_v13  ;;  %1102 = vmatpush1.bf16.msra.mxu1 %v1566_v14  ;;  %v1596_v34 = vld [vmem:[%s2078_s3 + $0x190] ss:$28 sps:$4 sm:$0xff]   ;;  %v1240_v38 = vld [vmem:[%s2077_s2] ss:$0 sm:$0xff]  ;;  %v1602_v63 = vld [vmem:[%s2078_s3 + $0x18] ss:$28 sps:$4 sm:$0xff]  }
  0x51   :  { %1062 = vmatprep.subr.bf16.mxu0 %v1571_v15  ;;  %1103 = vmatprep.subr.bf16.mxu1 %v1574_v16  ;;  %v1601_v35 = vld [vmem:[%s2078_s3 + $0x14] ss:$28 sps:$4 sm:$0xff]   ;;  %v1605_v1 = vld [vmem:[%s2078_s3 + $0x4c] ss:$28 sps:$4 sm:$0xff]   ;;  %v1609_v4 = vld [vmem:[%s2078_s3 + $0x84] ss:$28 sps:$4 sm:$0xff]  }
  0x52   :  { %1088 = vmatprep.mubr.bf16.mxu0 %v1657_v36  ;;  %1129 = vmatprep.mubr.bf16.mxu1 %v1657_v36  ;;  %v1599_v62 = vld [vmem:[%s2078_s3 + $0x10] ss:$28 sps:$4 sm:$0xff]   ;;  %v1603_v2 = vld [vmem:[%s2078_s3 + $0x48] ss:$28 sps:$4 sm:$0xff]   ;;  %v1607_v5 = vld [vmem:[%s2078_s3 + $0x80] ss:$28 sps:$4 sm:$0xff]  }
  0x53   :  { %v1606_v3 = vld [vmem:[%s2078_s3 + $0x50] ss:$28 sps:$4 sm:$0xff]   ;;  %v1610_v6 = vld [vmem:[%s2078_s3 + $0x88] ss:$28 sps:$4 sm:$0xff]   ;;  %v1613_v7 = vld [vmem:[%s2078_s3 + $0xbc] ss:$28 sps:$4 sm:$0xff]  }
  0x54   :  { %1063 = vmatpush1.bf16.msra.mxu0 %v1569_v17  ;;  %1104 = vmatpush1.bf16.msra.mxu1 %v1572_v18  ;;  %v1611_v8 = vld [vmem:[%s2078_s3 + $0xb8] ss:$28 sps:$4 sm:$0xff]   ;;  %v1614_v9 = vld [vmem:[%s2078_s3 + $0xc0] ss:$28 sps:$4 sm:$0xff]   ;;  %v1615_v11 = vld [vmem:[%s2078_s3 + $0xf0] ss:$28 sps:$4 sm:$0xff]  }
  0x55   :  { %1064 = vmatprep.subr.bf16.mxu0 %v1577_v19  ;;  %1105 = vmatprep.subr.bf16.mxu1 %v1580_v20  ;;  %v1617_v10 = vld [vmem:[%s2078_s3 + $0xf4] ss:$28 sps:$4 sm:$0xff]   ;;  %v1621_v13 = vld [vmem:[%s2078_s3 + $0x12c] ss:$28 sps:$4 sm:$0xff]   ;;  %v1625_v16 = vld [vmem:[%s2078_s3 + $0x164] ss:$28 sps:$4 sm:$0xff]  }
  0x56   :  { %v1618_v12 = vld [vmem:[%s2078_s3 + $0xf8] ss:$28 sps:$4 sm:$0xff]   ;;  %v1619_v14 = vld [vmem:[%s2078_s3 + $0x128] ss:$28 sps:$4 sm:$0xff]   ;;  %v1622_v15 = vld [vmem:[%s2078_s3 + $0x130] ss:$28 sps:$4 sm:$0xff]  }
  0x57   :  { %v1623_v17 = vld [vmem:[%s2078_s3 + $0x160] ss:$28 sps:$4 sm:$0xff]   ;;  %v1626_v18 = vld [vmem:[%s2078_s3 + $0x168] ss:$28 sps:$4 sm:$0xff]   ;;  %v1627_v20 = vld [vmem:[%s2078_s3 + $0x198] ss:$28 sps:$4 sm:$0xff]  }
  0x58   :  { %1065 = vmatpush1.bf16.msra.mxu0 %v1575_v21  ;;  %1106 = vmatpush1.bf16.msra.mxu1 %v1578_v22  ;;  %v1629_v19 = vld [vmem:[%s2078_s3 + $0x19c] ss:$28 sps:$4 sm:$0xff]   ;;  %v733_v22 = vlaneseq }
  0x59   :  { %1066 = vmatprep.subr.bf16.mxu0 %v1583_v23  ;;  %1107 = vmatprep.subr.bf16.mxu1 %v1586_v24  ;;  %v1630_v21 = vld [vmem:[%s2078_s3 + $0x1a0] ss:$28 sps:$4 sm:$0xff]   ;;  %s1658_s3 = smov [#allocation2]  }
  0x5a   :  { %v734_v23 = vshrl.u32 %v733_v22, 7 }
  0x5c   :  { %1067 = vmatpush1.bf16.msra.mxu0 %v1581_v25  ;;  %1108 = vmatpush1.bf16.msra.mxu1 %v1584_v26  ;;  %v735_v24 = vsub.s32 0, %v734_v23  ;;  %v743_v25 = vsub.s32 2, %v734_v23  ;;  %v731_v26 = vld [vmem:[%s2079_s4] sm:$0xff]  ;;  %s1232_s4 = sshll.u32 %s1658_s3, 4  ;;  %s1233_s4 = int_to_ptr.vmem [resolvable:$true] %s1232_s4 }
  0x5d   :  { %1068 = vmatprep.subr.bf16.mxu0 %v1589_v27  ;;  %1109 = vmatprep.subr.bf16.mxu1 %v1592_v28  ;;  %v739_v27 = vsub.s32 1, %v734_v23  ;;  %v747_v28 = vsub.s32 3, %v734_v23  ;;  %s1631_s18 = scalar_lea.vmem %s1233_s4, 896  ;;  %p1636_p1 = scmp.lt.s32.totalorder %s1233_s4, %s1233_s4 }
  0x5e   :  { %p1632_p0 = scmp.ne.s32.totalorder %s1233_s4, %s1631_s18  ;;  %p1637_p2 = scmp.lt.s32.totalorder %s1631_s18, %s1631_s18 }
  0x60   :  { %1069 = vmatpush1.bf16.msra.mxu0 %v1587_v29  ;;  %1110 = vmatpush1.bf16.msra.mxu1 %v1590_v30  ;;  %v736_v29 = vrot.slane %v731_v26, %v735_v24  ;;  %v744_v30 = vrot.slane %v731_v26, %v743_v25  ;;  %p1638_p3 = por %p1637_p2, %p1636_p1 }
  0x61   :  { %1070 = vmatprep.subr.bf16.mxu0 %v1595_v31  ;;  %1111 = vmatprep.subr.bf16.mxu1 %v1598_v32  ;;  %v740_v31 = vrot.slane %v731_v26, %v739_v27  ;;  %v748_v32 = vrot.slane %v731_v26, %v747_v28 }
  0x62   :  { %p1639_p4 = pnand %p1638_p3, %p1632_p0 }
  0x64   :  { %1071 = vmatpush1.bf16.msra.mxu0 %v1593_v33  ;;  %1112 = vmatpush1.bf16.msra.mxu1 %v1596_v34 }
  0x65   :  { %1464 = vmatprep.subr.bf16.mxu1 %v1655_v42  ;;  %1138 = vmatprep.subr.bf16.mxu0 %v1601_v35 }
  0xf5   :  { %v1376_v37 = vpop.f32.mrb[0].mxu0 }
  0xf6   :  { %v1377_v39 = vpop.f32.mrb[1].mxu0 }
  0xf7   :  { %v1378_v40 = vadd.f32 %v1377_v39, %v1376_v37  ;;  %v1379_v41 = vpop.f32.mrb[2].mxu0  ;;  %v1398_v43 = vpop.f32.mrb[0].mxu1 }
  0xf8   :  { %v1380_v44 = vpop.f32.mrb[3].mxu0  ;;  %v1399_v45 = vpop.f32.mrb[1].mxu1 }
  0xf9   :  { %v541_v46 = vadd.f32 %v1378_v40, %v1240_v38  ;;  %v1400_v47 = vadd.f32 %v1399_v45, %v1398_v43  ;;  %v1401_v48 = vpop.f32.mrb[2].mxu1  ;;  %v751_v45 = vsub.s32 4, %v734_v23 }
  0xfa   :  { %v1402_v49 = vpop.f32.mrb[3].mxu1 }
  0xfb   :  { %v581_v50 = vadd.f32 %v1400_v47, %v541_v46  ;;  %v759_v46 = vsub.s32 6, %v734_v23  ;;  %v755_v47 = vsub.s32 5, %v734_v23  ;;  %v752_v48 = vrot.slane %v731_v26, %v751_v45 }
  0xfd   :  { %v760_v49 = vrot.slane %v731_v26, %v759_v46 }
 0x115   :  { %v1420_v51 = vpop.f32.mrb[4].mxu0 }
 0x116   :  { %v1421_v52 = vpop.f32.mrb[5].mxu0 }
 0x117   :  { %v1422_v53 = vadd.f32 %v1421_v52, %v1420_v51  ;;  %v1423_v54 = vpop.f32.mrb[6].mxu0  ;;  %v660_v55 = vpop.f32.mrb[4].mxu1 }
 0x118   :  { %v1424_v56 = vpop.f32.mrb[7].mxu0  ;;  %v1462_v57 = vpop.f32.mrb[5].mxu1 }
 0x119   :  { %v621_v58 = vadd.f32 %v1422_v53, %v581_v50  ;;  %v663_v59 = vpop.f32.mrb[6].mxu1  ;;  %v756_v50 = vrot.slane %v731_v26, %v755_v47 }
 0x11a   :  { %v1463_v60 = vpop.f32.mrb[7].mxu1 }
 0x11b   :  { %v661_v61 = vadd.f32 %v660_v55, %v621_v58 }
 0x11d   :  { %v666_v0 = vpack.c.bf16 %v661_v61, %v661_v61 }
 0x11f   :  { %1089 = vmatmul.mubr.bf16.vlgmr.msra.gmra.mrb[8].mxu0 %v666_v0  ;;  %1130 = vmatmul.mubr.bf16.vlgmr.msra.gmra.mrb[8].mxu1 %v666_v0 }
 0x120   :  { %1139 = vmatpush1.bf16.msra.mxu0 %v1599_v62  ;;  %1465 = vmatpush3.bf16.msra.mxu1 %v1602_v63 }
 0x121   :  { %1140 = vmatprep.subr.bf16.mxu0 %v1605_v1  ;;  %1466 = vmatprep.subr.bf16.mxu1 %v1655_v42 }
 0x122   :  { %1170 = vmatprep.mubr.bf16.mxu0 %v1657_v36  ;;  %1480 = vmatprep.mubr.msk.bf16.mxu1 %vm1656_vm0, %v1655_v42 }
 0x124   :  { %1141 = vmatpush1.bf16.msra.mxu0 %v1603_v2  ;;  %1467 = vmatpush3.bf16.msra.mxu1 %v1606_v3 }
 0x125   :  { %1142 = vmatprep.subr.bf16.mxu0 %v1609_v4  ;;  %1468 = vmatprep.subr.bf16.mxu1 %v1655_v42 }
 0x128   :  { %1143 = vmatpush1.bf16.msra.mxu0 %v1607_v5  ;;  %1469 = vmatpush3.bf16.msra.mxu1 %v1610_v6 }
 0x129   :  { %1144 = vmatprep.subr.bf16.mxu0 %v1613_v7  ;;  %1470 = vmatprep.subr.bf16.mxu1 %v1655_v42 }
 0x12c   :  { %1145 = vmatpush1.bf16.msra.mxu0 %v1611_v8  ;;  %1471 = vmatpush3.bf16.msra.mxu1 %v1614_v9 }
 0x12d   :  { %1146 = vmatprep.subr.bf16.mxu0 %v1617_v10  ;;  %1472 = vmatprep.subr.bf16.mxu1 %v1655_v42 }
 0x130   :  { %1147 = vmatpush1.bf16.msra.mxu0 %v1615_v11  ;;  %1473 = vmatpush3.bf16.msra.mxu1 %v1618_v12 }
 0x131   :  { %1148 = vmatprep.subr.bf16.mxu0 %v1621_v13  ;;  %1474 = vmatprep.subr.bf16.mxu1 %v1655_v42 }
 0x134   :  { %1149 = vmatpush1.bf16.msra.mxu0 %v1619_v14  ;;  %1475 = vmatpush3.bf16.msra.mxu1 %v1622_v15 }
 0x135   :  { %1150 = vmatprep.subr.bf16.mxu0 %v1625_v16  ;;  %1476 = vmatprep.subr.bf16.mxu1 %v1655_v42 }
 0x138   :  { %1151 = vmatpush1.bf16.msra.mxu0 %v1623_v17  ;;  %1477 = vmatpush3.bf16.msra.mxu1 %v1626_v18 }
 0x139   :  { %1152 = vmatprep.subr.bf16.mxu0 %v1629_v19  ;;  %1478 = vmatprep.subr.bf16.mxu1 %v1655_v42 }
 0x13c   :  { %1153 = vmatpush1.bf16.msra.mxu0 %v1627_v20  ;;  %1479 = vmatpush3.bf16.msra.mxu1 %v1630_v21 }
 0x13f   :  { %1171 = vmatmul.mubr.bf16.vlgmr.msra.gmra.mrb[12].mxu0 %v666_v0  ;;  %1481 = vmatmul.mubr.bf16.vlgmr.msra.gmra.mrb[12].mxu1 %v666_v0 }
 0x1f2   :  { %v1090_v33 = vpop.f32.mrb[8].mxu0  ;;  %v1131_v42 = vpop.f32.mrb[8].mxu1 }
 0x1f3   :  { %v1091_v34 = vadd.f32 %v1090_v33, %v736_v29  ;;  %v1132_v35 = vadd.f32 %v1131_v42, %v744_v30  ;;  %v1092_v36 = vpop.f32.mrb[9].mxu0  ;;  %v1133_v37 = vpop.f32.mrb[9].mxu1 }
 0x1f4   :  { %v1093_v38 = vadd.f32 %v1092_v36, %v740_v31  ;;  %v1134_v39 = vadd.f32 %v1133_v37, %v748_v32  ;;  %v1094_v40 = vpop.f32.mrb[10].mxu0  ;;  %v1135_v41 = vpop.f32.mrb[10].mxu1 }
 0x1f5   :  { %1219 = vst [vmem:[#allocation2] sm:$0xff] %v1091_v34  ;;  %1221 = vst [vmem:[#allocation2 + $0x10] sm:$0xff] %v1132_v35  ;;  %v1095_v43 = vpop.f32.mrb[11].mxu0  ;;  %v1136_v44 = vpop.f32.mrb[11].mxu1 }
 0x1f6   :  { %1220 = vst [vmem:[#allocation2 + $0x8] sm:$0xff] %v1093_v38  ;;  %1222 = vst [vmem:[#allocation2 + $0x18] sm:$0xff] %v1134_v39 }
 0x212   :  { %v1172_v51 = vpop.f32.mrb[12].mxu0  ;;  %v1213_v52 = vpop.f32.mrb[12].mxu1 }
 0x213   :  { %v1173_v53 = vadd.f32 %v1172_v51, %v752_v48  ;;  %v1214_v54 = vadd.f32 %v1213_v52, %v760_v49  ;;  %v1174_v55 = vpop.f32.mrb[13].mxu0  ;;  %v1482_v56 = vpop.f32.mrb[13].mxu1 }
 0x214   :  { %v1175_v57 = vadd.f32 %v1174_v55, %v756_v50  ;;  %v1176_v58 = vpop.f32.mrb[14].mxu0  ;;  %v1216_v59 = vpop.f32.mrb[14].mxu1 }
 0x215   :  { %1223 = vst [vmem:[#allocation2 + $0x20] sm:$0xff] %v1173_v53  ;;  %1225 = vst [vmem:[#allocation2 + $0x30] sm:$0xff] %v1214_v54  ;;  %v1177_v60 = vpop.f32.mrb[15].mxu0  ;;  %v1483_v61 = vpop.f32.mrb[15].mxu1 }
 0x216   :  { %1224 = vst [vmem:[#allocation2 + $0x28] sm:$0xff] %v1175_v57 }
 0x217   :  { %1642 = shalt.err (!%p1639_p4)
}
 0x218   :  { %s1643_s20 = scalar_lea.hbm %s2080_s5, 896 }
 0x219   :  { %p1644_p5 = scmp.ne.s32.totalorder %s2080_s5, %s1643_s20  ;;  %p1647_p6 = scmp.lt.u32.totalorder %s1643_s20, %s2080_s5 }
 0x21b   :  { %p1649_p7 = pnand %p1647_p6, %p1644_p5 }
 0x21d   :  { %1652 = shalt.err (!%p1649_p7)
}
 0x21e   :  { %1235 = dma.vmem_to_hbm [thread:$0]  %s1233_s4, 896, %s2080_s5, [#allocation3]  }
 0x21f   :  { %1653 = dma.done.wait [#allocation3], 896  }
 0x220   :  { %1654 = vsyncadd [#allocation3], 4294966400 }
 0x221   :  { %1239 = vsyncpa [#allocation3], 1 }

</bundles_post_ra>
